<compile_context>
chip_gen: v6e
topology: v6e:2x2x1
jax: 0.10.0
libtpu: 0.0.40
codegen_flags: <defaults>
</compile_context>

<pallas_src>
import functools

import jax
import jax.numpy as jnp
from jax import lax
from jax.experimental import pallas as pl
from jax.experimental.pallas import tpu as pltpu


def _round_up(x, m):
    return (x + m - 1) // m * m


def _vmem_params():
    """Per-generation VMEM limit + per-step block budget (with headroom)."""
    try:
        cap = int(pltpu.get_tpu_info().vmem_capacity_bytes)
    except Exception:
        cap = 64 * 1024 * 1024  # conservative fallback: v7x per-TensorCore VMEM
    # Leave >=16 MiB for Mosaic internal scratch / other operands; never ask for
    # the full physical VMEM (v7x has only 64 MiB per core, v5e/v6e 128 MiB).
    vmem_limit = max(32 * 1024 * 1024, min(cap - 16 * 1024 * 1024, 64 * 1024 * 1024))
    budget = vmem_limit // 4  # per-step x(+mask) block; double-buffered -> half limit
    return budget, vmem_limit


def _choose_tiles(B, S, D, dtype, budget, masked):
    """Pick (batch tile, seq tile, hidden tile) with lane/sublane-padded budgeting."""
    itemsize = jnp.dtype(dtype).itemsize
    pack = 32 // itemsize               # sublane pack: 8 f32, 16 bf16, 32 i8
    unit = 32 if masked else pack       # bool mask block packs 32 sublanes
    dp = _round_up(D, 128)              # lane-padded row width of x
    mask_row = 128 if masked else 0     # (tb, ts, 1) bool block pads to 128 lanes

    def blk_bytes(tb, ts):
        return tb * _round_up(ts, unit) * (dp * itemsize + mask_row)

    # Batch tile: multiple-of-8 divisor of B (or B itself).  Prefer tb <= B//2 so
    # the leading "parallel" grid axis has >=2 steps (keeps both v7x TCs busy).
    cands = sorted({d for d in range(8, B + 1, 8) if B % d == 0} | {B}, reverse=True)
    fitting = [d for d in cands if blk_bytes(d, unit) <= budget]
    pool = fitting if fitting else [min(cands)]
    half = [d for d in pool if d <= B // 2]
    tb = max(half) if half else max(pool)
    # TODO(synk): huge B with no multiple-of-8 divisor still falls back to tb=B;
    # a batch-tail (masked partial output block) path would cover that shape.

    # Sequence tile: unit-aligned and within budget; partial tail handled in-kernel.
    per_row = tb * (dp * itemsize + mask_row)
    ts_cap = max(unit, (budget // per_row) // unit * unit)
    ts = S if S <= ts_cap else ts_cap

    # Hidden tile: split D across a second "parallel" axis only when the batch
    # axis cannot provide 2 steps (v7x has 2 TensorCores; harmless on v5e/v6e).
    td = D // 2 if (B // tb < 2 and D % 256 == 0) else D
    return tb, ts, td


def _sum_pool_kernel(x_ref, o_ref, acc_ref, *, ts, seq_len, tail):
    """No-mask path: out[b, d] = sum_s x[b, s, d] (f32 accumulation)."""
    s = pl.program_id(2)

    @pl.when(s == 0)
    def _():
        acc_ref[...] = jnp.zeros_like(acc_ref)

    def accumulate(apply_tail):
        xv = x_ref[...]                                     # (tb, ts, td)
        if apply_tail:
            sidx = s * ts + lax.broadcasted_iota(jnp.int32, xv.shape, 1)
            xv = jnp.where(sidx < seq_len, xv, jnp.zeros((), xv.dtype))
        acc_ref[...] += jnp.sum(xv, axis=1, dtype=jnp.float32)

    if tail:
        last = pl.num_programs(2) - 1
        pl.when(s != last)(lambda: accumulate(False))
        pl.when(s == last)(lambda: accumulate(True))       # only last step pays for tail mask
    else:
        accumulate(False)

    @pl.when(s == pl.num_programs(2) - 1)
    def _():
        o_ref[...] = acc_ref[...].astype(o_ref.dtype)


def _sum_pool_masked_kernel(m_ref, x_ref, o_ref, acc_ref, *, ts, seq_len, tail):
    """Masked path: VPU select (NaN-safe) + sublane sum; mask arrives as (tb, ts, 1) bool."""
    s = pl.program_id(2)

    @pl.when(s == 0)
    def _():
        acc_ref[...] = jnp.zeros_like(acc_ref)

    def accumulate(apply_tail):
        xv = x_ref[...]                                     # (tb, ts, td)
        keep = jnp.logical_not(m_ref[...])                  # (tb, ts, 1), already sublane-oriented
        if apply_tail:
            sidx = s * ts + lax.broadcasted_iota(jnp.int32, xv.shape, 1)
            keep = jnp.logical_and(keep, sidx < seq_len)
        xv = jnp.where(keep, xv, jnp.zeros((), xv.dtype))   # select, not multiply (NaN-safe)
        acc_ref[...] += jnp.sum(xv, axis=1, dtype=jnp.float32)

    if tail:
        last = pl.num_programs(2) - 1
        pl.when(s != last)(lambda: accumulate(False))
        pl.when(s == last)(lambda: accumulate(True))
    else:
        accumulate(False)

    @pl.when(s == pl.num_programs(2) - 1)
    def _():
        o_ref[...] = acc_ref[...].astype(o_ref.dtype)


def _pool_call(x, out_dtype, budget, vmem_limit, mask_col=None):
    B, S, D = x.shape
    masked = mask_col is not None
    tb, ts, td = _choose_tiles(B, S, D, x.dtype, budget, masked)
    nb, nd, ns = B // tb, D // td, pl.cdiv(S, ts)
    tail = (S % ts) != 0

    x_spec = pl.BlockSpec((tb, ts, td), lambda b, d, s: (b, s, d))
    out_spec = pl.BlockSpec((tb, td), lambda b, d, s: (b, d))
    compiler_params = pltpu.CompilerParams(
        dimension_semantics=("parallel", "parallel", "arbitrary"),
        vmem_limit_bytes=vmem_limit)
    out_shape = jax.ShapeDtypeStruct((B, D), out_dtype)
    scratch = [pltpu.VMEM((tb, td), jnp.float32)]

    if not masked:
        kernel = functools.partial(_sum_pool_kernel, ts=ts, seq_len=S, tail=tail)
        return pl.pallas_call(
            kernel, out_shape=out_shape, grid=(nb, nd, ns),
            in_specs=[x_spec], out_specs=out_spec, scratch_shapes=scratch,
            compiler_params=compiler_params,
        )(x)

    kernel = functools.partial(_sum_pool_masked_kernel, ts=ts, seq_len=S, tail=tail)
    m_spec = pl.BlockSpec((tb, ts, 1), lambda b, d, s: (b, s, 0))
    return pl.pallas_call(
        kernel, out_shape=out_shape, grid=(nb, nd, ns),
        in_specs=[m_spec, x_spec], out_specs=out_spec, scratch_shapes=scratch,
        compiler_params=compiler_params,
    )(mask_col, x)


def sum_pool_1d(x, mask=None):
    """x: (B, S, D); mask: optional (B, 1, S) (or (B, S)) bool, True = masked. Returns (B, D)."""
    if x.ndim != 3:
        raise ValueError(f"expected x of rank 3 (B, S, D), got shape {x.shape}")
    B, S, D = x.shape
    budget, vmem_limit = _vmem_params()

    if mask is None:
        # Lane-densify small hidden dims: view (B, S, D) as (B, S//k, k*D) (free,
        # row-major), pool in-kernel on lane-dense blocks, fold k groups outside.
        k = 1
        if D < 128 and 128 % D == 0 and S > 1:
            target = 256 if B < 16 else 128   # 256 lets the D axis feed both v7x TCs
            k = max(1, target // D)
            while k > 1 and S % k:
                k //= 2
        if k > 1:
            xk = x.reshape(B, S // k, k * D)
            y = _pool_call(xk, jnp.float32, budget, vmem_limit)        # (B, k*D) f32
            return y.reshape(B, k, D).sum(axis=1).astype(x.dtype)
        return _pool_call(x, x.dtype, budget, vmem_limit)

    # Normalize / validate the mask, then present it as a (B, S, 1) bool view so
    # its values land on sublanes in-kernel (no float cast, no relayout).
    if mask.ndim == 2 and mask.shape == (B, S):
        mask = mask[:, None, :]
    if mask.shape != (B, 1, S):
        raise ValueError(f"expected mask of shape {(B, 1, S)} or {(B, S)}, got {mask.shape}")
    mask_col = mask.astype(jnp.bool_).reshape(B, S, 1)
    return _pool_call(x, x.dtype, budget, vmem_limit, mask_col=mask_col)


if __name__ == "__main__":
    key = jax.random.PRNGKey(0)
    k1, k2 = jax.random.split(key)

    def ref(x, mask=None):
        if mask is None:
            return jnp.sum(x.astype(jnp.float32), axis=-2)
        keep = jnp.logical_not(jnp.transpose(mask, (0, 2, 1)))        # (B, S, 1)
        return jnp.sum(jnp.where(keep, x, 0).astype(jnp.float32), axis=-2)

    # Case 1: small hidden dim (exercises lane-densified no-mask path + masked select).
    B, S, D = 2, 8, 32
    x = jax.random.normal(k1, (B, S, D), dtype=jnp.float32)
    lengths = jnp.array([5, 8], dtype=jnp.int32)
    mask = jnp.arange(S)[None, None, :] >= lengths[:, None, None]     # (B, 1, S) bool

    y0 = jax.block_until_ready(sum_pool_1d(x, None))
    y1 = jax.block_until_ready(sum_pool_1d(x, mask))
    assert y0.shape == (B, D) and y1.shape == (B, D)
    assert jnp.allclose(y0, ref(x), atol=1e-5, rtol=1e-5)
    assert jnp.allclose(y1, ref(x, mask), atol=1e-5, rtol=1e-5)

    # Case 2: wider hidden dim (exercises the D-split parallel grid axis).
    B2, S2, D2 = 2, 16, 256
    x2 = jax.random.normal(k2, (B2, S2, D2), dtype=jnp.float32)
    mask2 = jnp.arange(S2)[None, None, :] >= jnp.array([9, 16])[:, None, None]
    y2 = jax.block_until_ready(sum_pool_1d(x2, mask2))
    y3 = jax.block_until_ready(sum_pool_1d(x2, None))
    assert jnp.allclose(y2, ref(x2, mask2), atol=1e-4, rtol=1e-5)
    assert jnp.allclose(y3, ref(x2), atol=1e-4, rtol=1e-5)

    # Case 3: bf16 input, masked path (f32 accumulation, bf16 output cast only).
    xb = x.astype(jnp.bfloat16)
    yb = jax.block_until_ready(sum_pool_1d(xb, mask))
    assert jnp.allclose(yb.astype(jnp.float32), ref(xb, mask), atol=1e-1, rtol=2e-2)

    print("KERNEL_OK")
</pallas_src>

<mosaic_0001>
module attributes {stable_mosaic.version = 11 : i64} {
  func.func @_sum_pool_kernel(%arg0: i32, %arg1: i32, %arg2: i32, %arg3: memref<2x1x128xf32, #tpu.memory_space<vmem>>, %arg4: memref<2x128xf32, #tpu.memory_space<vmem>>, %arg5: memref<2x128xf32, #tpu.memory_space<vmem>>) attributes {dimension_semantics = [#tpu.dimension_semantics<parallel>, #tpu.dimension_semantics<parallel>, #tpu.dimension_semantics<arbitrary>], iteration_bounds = array<i64: 1, 2, 1>, scalar_prefetch = 0 : i64, scratch_operands = 1 : i64, tpu.core_type = #tpu.core_type<tc>, window_params = [{transform_indices = @transform_0, window_bounds = array<i64: 2, 1, 128>}, {transform_indices = @transform_1, window_bounds = array<i64: 2, 128>}]} {
    %c0_i32 = arith.constant 0 : i32
    %0 = arith.cmpi eq, %arg2, %c0_i32 : i32
    %1 = arith.extui %0 : i1 to i32
    %c0_i32_0 = arith.constant 0 : i32
    %2 = arith.cmpi ne, %1, %c0_i32_0 : i32
    scf.if %2 {
      %cst_9 = arith.constant 0.000000e+00 : f32
      %11 = vector.broadcast %cst_9 : f32 to vector<2x128xf32>
      %c0_10 = arith.constant 0 : index
      %c0_11 = arith.constant 0 : index
      %12 = vector.load %arg5[%c0_10, %c0_11] : memref<2x128xf32, #tpu.memory_space<vmem>>, vector<2x128xf32>
      tpu.vector_store %arg5[%c0_10, %c0_11], %11 {strides = array<i32>} : memref<2x128xf32, #tpu.memory_space<vmem>>, vector<2x128xf32>,
    } else {
    }
    %c0 = arith.constant 0 : index
    %c0_1 = arith.constant 0 : index
    %c0_2 = arith.constant 0 : index
    %3 = vector.load %arg3[%c0, %c0_1, %c0_2] : memref<2x1x128xf32, #tpu.memory_space<vmem>>, vector<2x1x128xf32>
    %c0_3 = arith.constant 0 : index
    %c0_4 = arith.constant 0 : index
    %4 = vector.load %arg5[%c0_3, %c0_4] : memref<2x128xf32, #tpu.memory_space<vmem>>, vector<2x128xf32>
    %cst = arith.constant dense<0.000000e+00> : vector<2x128xf32>
    %5 = vector.multi_reduction <add>, %3, %cst [1] : vector<2x1x128xf32> to vector<2x128xf32>
    %6 = arith.addf %4, %5 : vector<2x128xf32>
    %c0_5 = arith.constant 0 : index
    %c0_6 = arith.constant 0 : index
    %7 = vector.load %arg5[%c0_5, %c0_6] : memref<2x128xf32, #tpu.memory_space<vmem>>, vector<2x128xf32>
    tpu.vector_store %arg5[%c0_5, %c0_6], %6 {strides = array<i32>} : memref<2x128xf32, #tpu.memory_space<vmem>>, vector<2x128xf32>,
    %c0_i32_7 = arith.constant 0 : i32
    %8 = arith.cmpi eq, %arg2, %c0_i32_7 : i32
    %9 = arith.extui %8 : i1 to i32
    %c0_i32_8 = arith.constant 0 : i32
    %10 = arith.cmpi ne, %9, %c0_i32_8 : i32
    scf.if %10 {
      %c0_9 = arith.constant 0 : index
      %c0_10 = arith.constant 0 : index
      %11 = vector.load %arg5[%c0_9, %c0_10] : memref<2x128xf32, #tpu.memory_space<vmem>>, vector<2x128xf32>
      %c0_11 = arith.constant 0 : index
      %c0_12 = arith.constant 0 : index
      %12 = vector.load %arg4[%c0_11, %c0_12] : memref<2x128xf32, #tpu.memory_space<vmem>>, vector<2x128xf32>
      tpu.vector_store %arg4[%c0_11, %c0_12], %11 {strides = array<i32>} : memref<2x128xf32, #tpu.memory_space<vmem>>, vector<2x128xf32>,
    } else {
    }
    return
  }
  func.func @transform_0(%arg0: i32, %arg1: i32, %arg2: i32) -> (i32, i32, i32) {
    %c0_i32 = arith.constant 0 : i32
    return %arg0, %arg2, %arg1 : i32, i32, i32
  }
  func.func @transform_1(%arg0: i32, %arg1: i32, %arg2: i32) -> (i32, i32) {
    %c0_i32 = arith.constant 0 : i32
    return %arg0, %arg1 : i32, i32
  }
}

</mosaic_0001>

<bundles_post_ra>
// kernel: tpu_custom_call.1
= control target key start
LH: loop header
LB: loop body
LE: loop exit
PB: predicated region body
PF: predicated region fallthrough
CT: control target
= control target key end

     0   :  { %6 = vsyncpa [#allocation4], 0  ;;  %s646_s0 = inlined_call_operand.hbm [shape: f32[2,1,256], index: 0, kind: input, shape index: {}]   ;;  %s647_s1 = inlined_call_operand.hbm [shape: f32[2,256], index: 1, kind: output, shape index: {}]  }
   0x1   :  { %8 = vsyncpa [#allocation4 + $0x1], 0 }
   0x2   :  { %9 = vsyncpa [#allocation5], 0 }
   0x3   :  { %11 = vsyncpa [#allocation5 + $0x1], 0  ;;  %s510_s6 = smov 0   ;;  %s512_s7 = smov 0  }
   0x4   :  { %s514_s8 = smov 0   ;;  %s516_s9 = smov 0  }
   0x5   :  { %s518_s10 = smov 0   ;;  %s520_s11 = smov 0  }
   0x6 LB: > { %s303_s12 = sadd.s32 4294967295, %s491_s11   ;;  %s304_s13 = sadd.s32 4294967294, %s491_s11   ;;  %s491_s11 = sphi %s520_s11, %s17_s11   ;;  %s487_s10 = sphi %s518_s10, %s658_s10   ;;  %s483_s9 = sphi %s516_s9, %s657_s9   ;;  %s479_s8 = sphi %s514_s8, %s656_s8   ;;  %s475_s7 = sphi %s512_s7, %s655_s7   ;;  %s471_s6 = sphi %s510_s6, %s654_s6  }
   0x7   : > { %s32_s14 = sadd.s32 1, %s487_s10  ;;  %s47_s15 = sadd.s32 1, %s479_s8 }
   0x8   : > { %p34_p0 = scmp.ge.s32.totalorder %s32_s14, 2  ;;  %p54_p1 = scmp.ne.s32.totalorder %s479_s8, %s475_s7 }
   0x9   : > { %p55_p2 = scmp.eq.s32.totalorder %s491_s11, 0  ;;  %p60_p3 = scmp.ne.s32.totalorder %s475_s7, %s471_s6 }
   0xa   : > { %s660_s14 = smov (%p34_p0, %s32_s14), 0  ;;  %p61_p5 = scmp.eq.s32.totalorder %s303_s12, 0 }
   0xb   : > { %p551_p4 = por %p55_p2, %p54_p1  ;;  %s43_s17 = ssub.s32 %s487_s10, %s660_s14 }
   0xc   : > { %p86_p6 = scmp.eq.s32.totalorder %s303_s12, 1  ;;  %p45_p7 = scmp.eq.s32.totalorder %s43_s17, 0 }
   0xd   : > { %p557_p8 = por %p61_p5, %p60_p3  ;;  %p92_p10 = scmp.eq.s32.totalorder %s304_s13, 1 }
   0xe   : > { %p561_p9 = por %p86_p6, %p54_p1  ;;  %p328_p13 = scmp.lt.s32.totalorder %s491_s11, 2 }
   0xf   : > { %s566_s20 = scalar_select %p45_p7, %s479_s8, %s47_s15  }
  0x10   : > { %p568_p11 = por %p92_p10, %p60_p3  ;;  %s112_s22 = sand.u32 1, %s479_s8  }
  0x11   : > { %s307_s23 = sshll.u32 %s112_s22, 1  ;;  %s308_s24 = sshll.u32 %s487_s10, 4 }
  0x12   : > { %s126_s27 = scalar_lea.hbm %s646_s0, %s308_s24  ;;  %s116_s28 = scalar_lea.vmem [#allocation3], %s307_s23 }
  0x13   : > { %s127_s29 = sshll.u32 %s116_s28, 4  ;;  %p581_p0 = pnand %p328_p13, %p551_p4  ;;  %s128_s29 = int_to_ptr.vmem [resolvable:$true] %s127_s29 }
  0x14   : > { %s113_s2 = scalar_lea.sflag [#allocation4], %s112_s22  ;;  %s396_s3 = scalar_lea.vmem %s128_s29, 32 }
  0x15   : > { %p385_p1 = pneg %p581_p0  ;;  %p397_p2 = scmp.ne.s32.totalorder %s128_s29, %s396_s3 }
  0x16   : > { %s493_s4 = smov [#allocation3]  }
  0x17   : > { %p399_p3 = pnand %p397_p2, %p385_p1  ;;  %s401_s5 = sshll.u32 %s493_s4, 4  ;;  %s402_s5 = int_to_ptr.vmem [resolvable:$false] %s401_s5 }
  0x18   : > { %s403_s12 = scalar_lea.vmem %s402_s5, 64  ;;  %p404_p6 = scmp.lt.s32.totalorder %s128_s29, %s402_s5 }
  0x19   : > { %p400_p5 = pneg %p399_p3  ;;  %p405_p7 = scmp.lt.s32.totalorder %s403_s12, %s396_s3 }
  0x1b   : > { %p406_p10 = por %p405_p7, %p404_p6 }
  0x1d   : > { %p407_p12 = pnand %p406_p10, %p400_p5 }
  0x1f   : > { %410 = shalt.err (!%p407_p12)
}
  0x20   : > { %s494_s13 = smov 32   ;;  %s495_s15 = smov 16  }
  0x21   : > { %s496_s16 = smov 1   ;;  %p309_p4 = scmp.ge.s32.totalorder %s491_s11, 1 }
  0x22   : > { %323 = dma.hbm_to_vmem [thread:$0]  (!%p581_p0), %s126_s27, 32, %s128_s29, %s113_s2, %s494_s13, %s495_s15, %s496_s16  }
  0x23   : > { %p135_p13 = scmp.lt.s32.totalorder %s491_s11, 3 }
  0x25   : > { %p136_p1 = pnand %p309_p4, %p135_p13 }
  0x26   : > { %s592_s17 = sand.u32 (!%p136_p1), 1, %s475_s7  }
  0x27   : > { %139 = sbr.rel (%p136_p1) target bundleno = 79 (0x4f), region = 24  ;;  %s310_s22 = sshll.u32 (!%p136_p1), %s592_s17, 1 }
  0x28   : > { %s142_s23 = scalar_lea.sflag (!%p136_p1), [#allocation4], %s592_s17  ;;  %s145_s24 = scalar_lea.vmem (!%p136_p1), [#allocation3], %s310_s22 }
  0x2c   : > { %462 = dma.done.wait (%p557_p8), %s142_s23, 32  }
  0x2d   : > { %464 = vsyncadd (%p557_p8), %s142_s23, 4294967264  ;;  %v181_v0 = vlaneseq  ;;  %v497_v1 = vmov 0.0   ;;  %v498_v2 = vmov 1966171168   ;;  %v170_v7 = vld [vmem:[%s145_s24] sm:$0x1] }
  0x2e   : > { %169 = vst [vmem:[#allocation2] sm:$0x3] %v497_v1  ;;  %v179_v3 = vunpack.c.l.s4 %v498_v2  ;;  %v171_v8 = vld [vmem:[%s145_s24 + $0x1] sm:$0x1]  ;;  %s163_s18 = scalar_lea.vmem [#allocation6], %s310_s22  ;;  %s313_s26 = sshll.u32 %s483_s9, 5 }
  0x2f   : > { %v182_v4 = vshrl.u32 %v181_v0, 7  ;;  %v177_v9 = vcombine.low %v170_v7, %v171_v8  ;;  %s216_s25 = sshll.u32 %s163_s18, 4  ;;  %s214_s29 = scalar_lea.hbm %s647_s1, %s313_s26  ;;  %s601_s25 = int_to_ptr.vmem [resolvable:$true] %s216_s25 }
  0x30   : > { %v180_v5 = vunpack.c.0.s8 %v179_v3  ;;  %s201_s30 = scalar_lea.sflag [#allocation5], %s592_s17  ;;  %s411_s2 = scalar_lea.vmem %s601_s25, 32 }
  0x31   : > { %p412_p8 = scmp.ne.s32.totalorder %s601_s25, %s411_s2  ;;  %s499_s3 = smov [#allocation6]  }
  0x32   : > { %v183_v6 = vsub.s32 %v180_v5, %v182_v4  ;;  %s415_s4 = sshll.u32 %s499_s3, 4  ;;  %s416_s4 = int_to_ptr.vmem [resolvable:$false] %s415_s4 }
  0x33   : > { %p413_p12 = pnand %p412_p8, %p561_p9  ;;  %s417_s9 = scalar_lea.vmem %s416_s4, 64 }
  0x34   : > { %v184_v10 = vrot.slane %v177_v9, %v183_v6  ;;  %p418_p2 = scmp.lt.s32.totalorder %s601_s25, %s416_s4  ;;  %p419_p3 = scmp.lt.s32.totalorder %s417_s9, %s411_s2 }
  0x35   : > { %v172_v11 = vld [vmem:[#allocation2] sm:$0x3]  ;;  %p414_p0 = pneg %p413_p12 }
  0x36   : > { %v191_v12 = vrot.slane %v184_v10, %v183_v6  ;;  %p420_p5 = por %p419_p3, %p418_p2 }
  0x38   : > { %v193_v13 = vadd.f32 %v191_v12, %v172_v11  ;;  %p421_p6 = pnand %p420_p5, %p414_p0 }
  0x3a   : > { %194 = vst [vmem:[#allocation2] sm:$0x3] %v193_v13 }
  0x41   : > { %v198_v14 = vld [vmem:[#allocation2] sm:$0x3] }
  0x42   : > { %199 = vst [vmem:[%s163_s18] sm:$0x3] %v198_v14 }
  0x43   : > { %424 = shalt.err (!%p421_p6)
}
  0x44   : > { %s425_s5 = scalar_lea.hbm %s214_s29, 32  ;;  %s429_s15 = scalar_lea.hbm %s647_s1, 64 }
  0x45   : > { %p426_p7 = scmp.ne.s32.totalorder %s214_s29, %s425_s5  ;;  %p430_p13 = scmp.lt.s32.totalorder %s214_s29, %s647_s1 }
  0x46   : > { %p431_p1 = scmp.lt.s32.totalorder %s429_s15, %s425_s5 }
  0x47   : > { %p427_p10 = pnand %p426_p7, %p561_p9 }
  0x48   : > { %p432_p8 = por %p431_p1, %p430_p13 }
  0x49   : > { %p428_p4 = pneg %p427_p10 }
  0x4b   : > { %p433_p12 = pnand %p432_p8, %p428_p4 }
  0x4d   : > { %436 = shalt.err (!%p433_p12)
}
  0x4e   : > { %318 = dma.vmem_to_hbm [thread:$0]  (%p561_p9), %s601_s25, 32, %s214_s29, %s201_s30  }
  0x4f PF: > { %s228_s22 = sand.u32 1, %s471_s6   ;;  %p653_p0 = scmp.ge.s32.totalorder %s491_s11, 2 }
  0x50   : > { %s229_s23 = scalar_lea.sflag [#allocation5], %s228_s22 }
  0x51   : > { %p325_p2 = pnand %p653_p0, %p568_p11 }
  0x53   : > { %p326_p3 = pneg %p325_p2 }
  0x55   : > { %466 = dma.done.wait (%p326_p3), %s229_s23, 32  }
  0x56   : > { %468 = vsyncadd (%p326_p3), %s229_s23, 4294967264  ;;  %s17_s11 = sadd.s32 1, %s491_s11   ;;  %s654_s6 = smov %s475_s7 }
  0x57   : > { %p14_p5 = scmp.ge.s32.totalorder %s17_s11, 4   ;;  %s655_s7 = smov %s479_s8 }
  0x58   : > { %s656_s8 = smov %s566_s20  ;;  %s657_s9 = smov %s487_s10 }
  0x59   : > { %s658_s10 = smov %s660_s14  ;;  %16 = sbr.rel (!%p14_p5) target bundleno = 6 (0x6), region = 77 }
  0x5e   :  { %234 = vsyncpa [#allocation4], 1 }
  0x5f   :  { %236 = vsyncpa [#allocation4 + $0x1], 1 }
  0x60   :  { %237 = vsyncpa [#allocation5], 1 }
  0x61   :  { %239 = vsyncpa [#allocation5 + $0x1], 1 }

</bundles_post_ra>
